<compile_context>
chip_gen: v5e
topology: v5e:2x2
jax: 0.10.0
libtpu: 0.0.40
codegen_flags: <defaults>
</compile_context>

<pallas_src>
import functools

import jax
import jax.numpy as jnp
from jax.experimental import pallas as pl
from jax.experimental.pallas import tpu as pltpu


def _round_up(x, m):
    return ((x + m - 1) // m) * m


def _embedding_kernel(x_ref, w_ref, b_ref, o_ref, *, activation):
    # x_ref: (BM, K)  w_ref: (K, N)  b_ref: (1, N)  o_ref: (BM, N)
    acc = jnp.dot(x_ref[...], w_ref[...], preferred_element_type=jnp.float32)
    acc = acc + b_ref[...].astype(jnp.float32)
    if activation == "sigmoid":
        acc = 1.0 / (1.0 + jnp.exp(-acc))
    elif activation == "tanh":
        acc = jnp.tanh(acc)
    elif activation == "relu":
        acc = jnp.maximum(acc, 0.0)
    o_ref[...] = acc.astype(o_ref.dtype)


def _linear_act(x2d, weight, bias, activation, *, bm_cap=256):
    """Fused (x @ W + b) -> activation, tiled only over rows (lane-dense N)."""
    M, K = x2d.shape
    Kw, N = weight.shape
    assert K == Kw, (K, Kw)

    # Few, fat row-blocks: block rows are a multiple of 8 (sublane), capped so a
    # double-buffered (BM, N) f32 output tile stays small relative to VMEM on
    # every generation (v7x has only 64 MiB physical).
    BM = min(bm_cap, _round_up(M, 8))
    M_pad = _round_up(M, BM)
    if M_pad != M:
        x2d = jnp.pad(x2d, ((0, M_pad - M), (0, 0)))

    itemsize = jnp.dtype(x2d.dtype).itemsize
    kernel = functools.partial(_embedding_kernel, activation=activation)

    out = pl.pallas_call(
        kernel,
        out_shape=jax.ShapeDtypeStruct((M_pad, N), x2d.dtype),
        grid=(M_pad // BM,),
        in_specs=[
            pl.BlockSpec((BM, K), lambda i: (i, 0)),   # activations, tiled over rows
            pl.BlockSpec((K, N), lambda i: (0, 0)),    # full weight, resident
            pl.BlockSpec((1, N), lambda i: (0, 0)),    # full bias, resident
        ],
        out_specs=pl.BlockSpec((BM, N), lambda i: (i, 0)),  # last dim = full N (lane-dense)
        compiler_params=pltpu.CompilerParams(
            dimension_semantics=("parallel",),  # shardable across TCs on v7x
        ),
        cost_estimate=pl.CostEstimate(
            flops=2 * M_pad * K * N,
            transcendentals=M_pad * N if activation in ("sigmoid", "tanh") else 0,
            bytes_accessed=(M_pad * K + K * N + N + M_pad * N) * itemsize,
        ),
    )(x2d, weight, bias.reshape(1, N))

    return out[:M] if M_pad != M else out


def embedding_forward(data, weight, bias, *, num_features, num_audio_channels,
                      embedding_size, activation, dim_to_embed=-1, reshape=True):
    """JAX/Pallas equivalent of Embedding.forward."""
    if isinstance(dim_to_embed, int):
        dim_to_embed = [dim_to_embed]
    activation = list(activation)

    # TODO(synk): 'gated_tanh' pre-projection (embed_linear * embed_gate) not implemented.

    shape = list(data.shape)
    _dims = []
    for _dim in dim_to_embed:
        if _dim == -1:
            _dim = len(shape) - 1
        data = jnp.swapaxes(data, _dim, -1)
        _dims.append(_dim)
    keep_shape = tuple(v for i, v in enumerate(shape) if i not in _dims)
    data = data.reshape(keep_shape + (-1,))

    K = data.shape[-1]
    N = num_features * num_audio_channels * embedding_size
    x2d = data.reshape(-1, K)

    # Elementwise activation that can be fused into the matmul epilogue
    # (mirrors the torch elif-chain order: sigmoid > tanh > relu > softmax).
    fused = None
    for act in ("sigmoid", "tanh", "relu"):
        if act in activation:
            fused = act
            break

    out2d = _linear_act(x2d, weight, bias, fused)

    out = out2d.reshape(keep_shape + (N,))
    if reshape:
        out = out.reshape(
            keep_shape + (num_features, num_audio_channels, embedding_size))

    if fused is None and "softmax" in activation:
        out = jax.nn.softmax(out, axis=-1)
    if "unit_norm" in activation:
        nrm = jnp.sqrt(jnp.sum(out * out, axis=-1, keepdims=True))
        out = out / jnp.maximum(nrm, 1e-12)
    elif "l1_norm" in activation:
        nrm = jnp.sum(jnp.abs(out), axis=-1, keepdims=True)
        out = out / jnp.maximum(nrm, 1e-12)
    return out


if __name__ == "__main__":
    key = jax.random.PRNGKey(0)
    k_data, k_w = jax.random.split(key)

    # Small shapes consistent with a RecurrentStack -> Embedding mask head:
    # data is (batch, sequence, hidden_size); the embedding maps hidden_size to
    # num_features * num_audio_channels * embedding_size = 128 (lane-dense).
    batch, seq_len, hidden_size = 2, 16, 32
    num_features, num_audio_channels, embedding_size = 16, 1, 8
    out_features = num_features * num_audio_channels * embedding_size  # 128
    activation = ["sigmoid"]  # mask-inference head

    data = jax.random.normal(k_data, (batch, seq_len, hidden_size), jnp.float32)
    # Matches the module's init: xavier_normal_ weights, zero bias.
    std = (2.0 / (hidden_size + out_features)) ** 0.5
    weight = std * jax.random.normal(k_w, (hidden_size, out_features), jnp.float32)
    bias = jnp.zeros((out_features,), jnp.float32)

    out = embedding_forward(
        data, weight, bias,
        num_features=num_features,
        num_audio_channels=num_audio_channels,
        embedding_size=embedding_size,
        activation=activation,
    )
    out = jax.block_until_ready(out)

    # Pure-JAX reference.
    ref = 1.0 / (1.0 + jnp.exp(-(data.reshape(-1, hidden_size) @ weight + bias)))
    ref = ref.reshape(batch, seq_len, num_features, num_audio_channels, embedding_size)

    assert out.shape == (batch, seq_len, num_features, num_audio_channels,
                         embedding_size), out.shape
    assert out.dtype == data.dtype
    assert jnp.allclose(out, ref, atol=1e-5, rtol=1e-5)

    print("KERNEL_OK")
</pallas_src>

<mosaic_0001>
module attributes {stable_mosaic.version = 11 : i64} {
  func.func @_embedding_kernel(%arg0: i32, %arg1: memref<32x32xf32, #tpu.memory_space<vmem>>, %arg2: memref<32x128xf32, #tpu.memory_space<vmem>>, %arg3: memref<1x128xf32, #tpu.memory_space<vmem>>, %arg4: memref<32x128xf32, #tpu.memory_space<vmem>>) attributes {dimension_semantics = [#tpu.dimension_semantics<parallel>], iteration_bounds = array<i64: 1>, scalar_prefetch = 0 : i64, scratch_operands = 0 : i64, tpu.core_type = #tpu.core_type<tc>, window_params = [{transform_indices = @transform_0, window_bounds = array<i64: 32, 32>}, {pipeline_mode = #tpu.pipeline_mode<synchronous>, transform_indices = @transform_1, window_bounds = array<i64: 32, 128>}, {pipeline_mode = #tpu.pipeline_mode<synchronous>, transform_indices = @transform_2, window_bounds = array<i64: 1, 128>}, {transform_indices = @transform_3, window_bounds = array<i64: 32, 128>}]} {
    %c0 = arith.constant 0 : index
    %c0_0 = arith.constant 0 : index
    %0 = vector.load %arg1[%c0, %c0_0] : memref<32x32xf32, #tpu.memory_space<vmem>>, vector<32x32xf32>
    %c0_1 = arith.constant 0 : index
    %c0_2 = arith.constant 0 : index
    %1 = vector.load %arg2[%c0_1, %c0_2] : memref<32x128xf32, #tpu.memory_space<vmem>>, vector<32x128xf32>
    %cst = arith.constant dense<0.000000e+00> : vector<32x128xf32>
    %2 = tpu.matmul %0, %1, %cst {dimension_numbers = #tpu.dot_dimension_numbers<[1], [0], [0], [1], [0, 0, 1, 1], [], []>} : vector<32x32xf32>, vector<32x128xf32>, vector<32x128xf32> -> vector<32x128xf32>
    %c0_3 = arith.constant 0 : index
    %c0_4 = arith.constant 0 : index
    %3 = vector.load %arg3[%c0_3, %c0_4] : memref<1x128xf32, #tpu.memory_space<vmem>>, vector<1x128xf32>
    %4 = vector.broadcast %3 : vector<1x128xf32> to vector<32x128xf32>
    %5 = arith.addf %2, %4 : vector<32x128xf32>
    %cst_5 = arith.constant 0.000000e+00 : f32
    %6 = vector.broadcast %cst_5 : f32 to vector<32x128xf32>
    %7 = arith.subf %6, %5 : vector<32x128xf32>
    %8 = math.exp %7 : vector<32x128xf32>
    %cst_6 = arith.constant 1.000000e+00 : f32
    %9 = vector.broadcast %cst_6 : f32 to vector<32x128xf32>
    %10 = arith.addf %9, %8 : vector<32x128xf32>
    %cst_7 = arith.constant 1.000000e+00 : f32
    %11 = vector.broadcast %cst_7 : f32 to vector<32x128xf32>
    %12 = arith.divf %11, %10 : vector<32x128xf32>
    %c0_8 = arith.constant 0 : index
    %c0_9 = arith.constant 0 : index
    %13 = vector.load %arg4[%c0_8, %c0_9] : memref<32x128xf32, #tpu.memory_space<vmem>>, vector<32x128xf32>
    tpu.vector_store %arg4[%c0_8, %c0_9], %12 {strides = array<i32>} : memref<32x128xf32, #tpu.memory_space<vmem>>, vector<32x128xf32>,
    return
  }
  func.func @transform_0(%arg0: i32) -> (i32, i32) {
    %c0_i32 = arith.constant 0 : i32
    %c0_i32_0 = arith.constant 0 : i32
    return %arg0, %c0_i32 : i32, i32
  }
  func.func @transform_1(%arg0: i32) -> (i32, i32) {
    %c0_i32 = arith.constant 0 : i32
    %c0_i32_0 = arith.constant 0 : i32
    %c0_i32_1 = arith.constant 0 : i32
    return %c0_i32, %c0_i32_0 : i32, i32
  }
  func.func @transform_2(%arg0: i32) -> (i32, i32) {
    %c0_i32 = arith.constant 0 : i32
    %c0_i32_0 = arith.constant 0 : i32
    %c0_i32_1 = arith.constant 0 : i32
    return %c0_i32, %c0_i32_0 : i32, i32
  }
  func.func @transform_3(%arg0: i32) -> (i32, i32) {
    %c0_i32 = arith.constant 0 : i32
    %c0_i32_0 = arith.constant 0 : i32
    return %arg0, %c0_i32 : i32, i32
  }
}

</mosaic_0001>

<bundles_post_ra>
// kernel: tpu_custom_call.1
= control target key start
LH: loop header
LB: loop body
LE: loop exit
PB: predicated region body
PF: predicated region fallthrough
CT: control target
= control target key end

     0   :  { %8 = vsyncpa [#allocation3], 0  ;;  %s364_s0 = inlined_call_operand.hbm [shape: f32[32,32], index: 0, kind: input, shape index: {}]   ;;  %s365_s1 = inlined_call_operand.hbm [shape: f32[32,128], index: 1, kind: input, shape index: {}]   ;;  %s366_s2 = inlined_call_operand.vmem [shape: f32[1,128], index: 2, kind: input, shape index: {}]   ;;  %s367_s3 = inlined_call_operand.hbm [shape: f32[32,128], index: 3, kind: output, shape index: {}]  }
   0x1   :  { %9 = vsyncpa [#allocation6], 0 }
   0x2   :  { %10 = vsyncpa [#allocation4], 0  ;;  %s15_s14 = sshll.u32 %s364_s0, 4  ;;  %s317_s15 = smov [#allocation2]   ;;  %s16_s14 = int_to_ptr.hbm [resolvable:$true] %s15_s14 }
   0x3   :  { %s17_s16 = sshll.u32 %s317_s15, 4  ;;  %s28_s19 = sshll.u32 %s365_s1, 4  ;;  %s18_s16 = int_to_ptr.vmem [resolvable:$true] %s17_s16  ;;  %s29_s19 = int_to_ptr.hbm [resolvable:$true] %s28_s19 }
   0x4   :  { %s318_s20 = smov 128   ;;  %s319_s21 = smov 8  }
   0x5   :  { %23 = dma.hbm_to_vmem [thread:$0]  %s16_s14, 512, %s18_s16, [#allocation3], %s318_s20, %s318_s20, %s319_s21  }
   0x6   :  { %s320_s22 = smov [#allocation5]  }
   0x7   :  { %s30_s23 = sshll.u32 %s320_s22, 4  ;;  %s31_s23 = int_to_ptr.vmem [resolvable:$true] %s30_s23 }
   0x8   :  { %36 = dma.hbm_to_vmem [thread:$0]  %s29_s19, 512, %s31_s23, [#allocation6], %s318_s20, %s318_s20, %s319_s21  }
   0x9   :  { %311 = dma.done.wait [#allocation3], 512  }
   0xa   :  { %312 = vsyncadd [#allocation3], 4294966784 }
   0xb   :  { %313 = dma.done.wait [#allocation6], 512  }
   0xc   :  { %314 = vsyncadd [#allocation6], 4294966784  ;;  %v54_v0 = vld [vmem:[#allocation5 + $0x18] sm:$0xff]  ;;  %v53_v1 = vld [vmem:[#allocation5 + $0x10] sm:$0xff]  ;;  %vm59_vm0 = vcmask 261120   ;;  %s187_s27 = sshll.u32 %s367_s3, 4  ;;  %s188_s27 = int_to_ptr.hbm [resolvable:$true] %s187_s27 }
   0xd   :  { %84 = vmatpush.msra.mxu0 %v54_v0  ;;  %205 = vmatpush.msra.mxu1 %v54_v0  ;;  %v52_v2 = vld [vmem:[#allocation5 + $0x8] sm:$0xff]  ;;  %v51_v3 = vld [vmem:[#allocation5] sm:$0xff]  ;;  %v49_v6 = vld [vmem:[#allocation2 + $0x10] sm:$0xff] }
   0xe   :  { %206 = vmatpush.msra.mxu2 %v54_v0  ;;  %207 = vmatpush.msra.mxu3 %v54_v0  ;;  %v47_v4 = vld [vmem:[#allocation2] sm:$0xff]  ;;  %v48_v5 = vld [vmem:[#allocation2 + $0x8] sm:$0xff]  ;;  %v50_v7 = vld [vmem:[#allocation2 + $0x18] sm:$0xff] }
   0xf   :  { %85 = vmatpush.msra.mxu0 %v53_v1  ;;  %208 = vmatpush.msra.mxu1 %v53_v1  ;;  %v222_v8 = vld [vmem:[%s366_s2] ss:$0 sm:$0xff]  ;;  %s321_s2 = smov [#allocation7]  }
  0x10   :  { %209 = vmatpush.msra.mxu2 %v53_v1  ;;  %210 = vmatpush.msra.mxu3 %v53_v1  ;;  %s185_s24 = sshll.u32 %s321_s2, 4  ;;  %s186_s24 = int_to_ptr.vmem [resolvable:$true] %s185_s24 }
  0x11   :  { %86 = vmatpush.msra.mxu0 %v52_v2  ;;  %211 = vmatpush.msra.mxu1 %v52_v2 }
  0x12   :  { %212 = vmatpush.msra.mxu2 %v52_v2  ;;  %213 = vmatpush.msra.mxu3 %v52_v2 }
  0x13   :  { %87 = vmatpush.msra.mxu0 %v51_v3  ;;  %214 = vmatpush.msra.mxu1 %v51_v3 }
  0x14   :  { %215 = vmatpush.msra.mxu2 %v51_v3  ;;  %216 = vmatpush.msra.mxu3 %v51_v3 }
  0x15   :  { %201 = vmatmul.msk.f32.vlgmr.msra.gmra.mxu0 %vm59_vm0, %v47_v4  ;;  %202 = vmatmul.msk.f32.vlgmr.msra.gmra.mxu1 %vm59_vm0, %v48_v5 }
  0x16   :  { %203 = vmatmul.msk.f32.vlgmr.msra.gmra.mxu2 %vm59_vm0, %v49_v6  ;;  %204 = vmatmul.msk.f32.vlgmr.msra.gmra.mxu3 %vm59_vm0, %v50_v7 }
  0x92   :  { %v89_v9 = vpop.f32.mrf.mxu0  ;;  %v92_v10 = vpop.f32.mrf.mxu1 }
  0x93   :  { %v90_v11 = vadd.f32 %v222_v8, %v89_v9  ;;  %v93_v12 = vadd.f32 %v222_v8, %v92_v10 }
  0x95   :  { %v101_v13 = vsub.f32 0.0, %v90_v11  ;;  %v102_v14 = vsub.f32 0.0, %v93_v12 }
  0x97   :  { %v105_v15 = vmul.f32 1.442695, %v101_v13  ;;  %v107_v16 = vmul.f32 1.442695, %v102_v14 }
  0x99   :  { %223 = vpow2.f32 %v105_v15  ;;  %v95_v17 = vpop.f32.mrf.mxu2  ;;  %v98_v18 = vpop.f32.mrf.mxu3 }
  0x9a   :  { %225 = vpow2.f32 %v107_v16  ;;  %v96_v19 = vadd.f32 %v222_v8, %v95_v17  ;;  %v99_v20 = vadd.f32 %v222_v8, %v98_v18 }
  0x9c   :  { %v103_v21 = vsub.f32 0.0, %v96_v19  ;;  %v104_v22 = vsub.f32 0.0, %v99_v20 }
  0x9e   :  { %v109_v23 = vmul.f32 1.442695, %v103_v21  ;;  %v111_v24 = vmul.f32 1.442695, %v104_v22 }
  0x9f   :  { %v224_v25 = vpop.eup %223 }
  0xa0   :  { %v226_v26 = vpop.eup %225  ;;  %v113_v27 = vadd.f32 1.0, %v224_v25  ;;  %227 = vpow2.f32 %v109_v23 }
  0xa1   :  { %v114_v28 = vadd.f32 1.0, %v226_v26  ;;  %229 = vpow2.f32 %v111_v24 }
  0xa2   :  { %231 = vrcp.f32 %v113_v27  ;;  %vm122_vm1 = vweird.f32 %v113_v27  ;;  %v128_v38 = vand.u32 2147483648, %v113_v27  ;;  %v126_v42 = vand.u32 2147483647, %v113_v27 }
  0xa3   :  { %233 = vrcp.f32 %v114_v28  ;;  %v143_v41 = vand.u32 2147483648, %v114_v28  ;;  %vm137_vm3 = vweird.f32 %v114_v28  ;;  %v141_v44 = vand.u32 2147483647, %v114_v28 }
  0xa4   :  { %v129_v48 = vor.u32 1.1754944e-38, %v128_v38  ;;  %vm127_vm6 = vcmp.eq.f32.partialorder %v126_v42, 8.507059e+37 }
  0xa5   :  { %v144_v51 = vor.u32 1.1754944e-38, %v143_v41  ;;  %vm142_vm8 = vcmp.eq.f32.partialorder %v141_v44, 8.507059e+37 }
  0xa6   :  { %v228_v29 = vpop.eup %227 }
  0xa7   :  { %v230_v30 = vpop.eup %229  ;;  %v115_v31 = vadd.f32 1.0, %v228_v29 }
  0xa8   :  { %v232_v32 = vpop.eup %231  ;;  %v116_v33 = vadd.f32 1.0, %v230_v30 }
  0xa9   :  { %v234_v34 = vpop.eup %233  ;;  %v118_v35 = vmul.f32 %v232_v32, %v113_v27  ;;  %235 = vrcp.f32 %v115_v31  ;;  %vm123_vm2 = vweird.f32 %v232_v32  ;;  %v158_v57 = vand.u32 2147483648, %v115_v31 }
  0xaa   :  { %v133_v36 = vmul.f32 %v234_v34, %v114_v28  ;;  %237 = vrcp.f32 %v116_v33  ;;  %vm138_vm4 = vweird.f32 %v234_v34  ;;  %vm124_vm5 = vmor %vm122_vm1, %vm123_vm2  ;;  %v173_v61 = vand.u32 2147483648, %v116_v33 }
  0xab   :  { %v119_v37 = vsub.f32 1.0, %v118_v35  ;;  %vm139_vm7 = vmor %vm137_vm3, %vm138_vm4  ;;  %v156_v62 = vand.u32 2147483647, %v115_v31  ;;  %v171_v0 = vand.u32 2147483647, %v116_v33  ;;  %vm152_vm11 = vweird.f32 %v115_v31 }
  0xac   :  { %v134_v39 = vsub.f32 1.0, %v133_v36  ;;  %v159_v2 = vor.u32 1.1754944e-38, %v158_v57  ;;  %vm167_vm12 = vweird.f32 %v116_v33  ;;  %v174_v4 = vor.u32 1.1754944e-38, %v173_v61 }
  0xad   :  { %v120_v40 = vmul.f32 %v232_v32, %v119_v37  ;;  %vm157_vm14 = vcmp.eq.f32.partialorder %v156_v62, 8.507059e+37  ;;  %vm172_vm0 = vcmp.eq.f32.partialorder %v171_v0, 8.507059e+37 }
  0xae   :  { %v135_v43 = vmul.f32 %v234_v34, %v134_v39 }
  0xaf   :  { %v236_v45 = vpop.eup %235  ;;  %v121_v46 = vadd.f32 %v232_v32, %v120_v40 }
  0xb0   :  { %v238_v47 = vpop.eup %237  ;;  %v148_v49 = vmul.f32 %v236_v45, %v115_v31  ;;  %v136_v50 = vadd.f32 %v234_v34, %v135_v43  ;;  %vm153_vm9 = vweird.f32 %v236_v45 }
  0xb1   :  { %v163_v52 = vmul.f32 %v238_v47, %v116_v33  ;;  %v125_v53 = vsel %vm124_vm5, %v232_v32, %v121_v46  ;;  %vm168_vm10 = vweird.f32 %v238_v47  ;;  %vm154_vm13 = vmor %vm152_vm11, %vm153_vm9 }
  0xb2   :  { %v149_v54 = vsub.f32 1.0, %v148_v49  ;;  %v130_v55 = vsel %vm127_vm6, %v129_v48, %v125_v53  ;;  %v140_v56 = vsel %vm139_vm7, %v234_v34, %v136_v50  ;;  %vm169_vm15 = vmor %vm167_vm12, %vm168_vm10 }
  0xb3   :  { %v164_v58 = vsub.f32 1.0, %v163_v52  ;;  %v145_v59 = vsel %vm142_vm8, %v144_v51, %v140_v56  ;;  %177 = vst [vmem:[#allocation7] sm:$0xff] %v130_v55 }
  0xb4   :  { %v150_v60 = vmul.f32 %v236_v45, %v149_v54  ;;  %178 = vst [vmem:[#allocation7 + $0x8] sm:$0xff] %v145_v59 }
  0xb5   :  { %v165_v63 = vmul.f32 %v238_v47, %v164_v58 }
  0xb6   :  { %v151_v1 = vadd.f32 %v236_v45, %v150_v60 }
  0xb7   :  { %v166_v3 = vadd.f32 %v238_v47, %v165_v63 }
  0xb8   :  { %v155_v5 = vsel %vm154_vm13, %v236_v45, %v151_v1 }
  0xb9   :  { %v160_v6 = vsel %vm157_vm14, %v159_v2, %v155_v5  ;;  %v170_v7 = vsel %vm169_vm15, %v238_v47, %v166_v3 }
  0xba   :  { %v175_v8 = vsel %vm172_vm0, %v174_v4, %v170_v7  ;;  %179 = vst [vmem:[#allocation7 + $0x10] sm:$0xff] %v160_v6 }
  0xbb   :  { %180 = vst [vmem:[#allocation7 + $0x18] sm:$0xff] %v175_v8 }
  0xbc   :  { %193 = dma.vmem_to_hbm [thread:$0]  %s186_s24, 512, %s188_s27, [#allocation4], %s318_s20, %s318_s20, %s319_s21  }
  0xbd   :  { %315 = dma.done.wait [#allocation4], 512  }
  0xbe   :  { %316 = vsyncadd [#allocation4], 4294966784 }
  0xbf   :  { %198 = vsyncpa [#allocation3], 1 }
  0xc0   :  { %199 = vsyncpa [#allocation6], 1 }
  0xc1   :  { %200 = vsyncpa [#allocation4], 1 }

</bundles_post_ra>
